<compile_context>
chip_gen: v6e
topology: v6e:2x2x1
jax: 0.10.0
libtpu: 0.0.40
codegen_flags: <defaults>
</compile_context>

<pallas_src>
import jax
import jax.numpy as jnp
from jax.experimental import pallas as pl
from jax.experimental.pallas import tpu as pltpu


# ----------------------------------------------------------------------------
# Fully fused forward kernel.
#   refs layout:
#     [player_ids, team_ids, player_emb, team_emb, adj_pt, adj_tp,
#      (w_rel_plays, w_root_plays, b_plays, w_rel_rev, w_root_rev, b_rev) * L,
#      lin_w (T, H, out_ch), lin_b,
#      y_out, team_feats_out]
# ----------------------------------------------------------------------------
def _make_fused_kernel(num_layers, num_graphs, teams_per_graph):
    def kernel(*refs):
        (pid_ref, tid_ref, pemb_ref, temb_ref,
         adj_pt_ref, adj_tp_ref) = refs[:6]
        layer_refs = refs[6:6 + 6 * num_layers]
        lin_w_ref = refs[6 + 6 * num_layers]
        lin_b_ref = refs[7 + 6 * num_layers]
        y_ref = refs[8 + 6 * num_layers]
        team_ref = refs[9 + 6 * num_layers]

        # bf16 MXU matmul with f32 accumulation.
        def mm(a, b):
            return jnp.dot(a.astype(jnp.bfloat16), b.astype(jnp.bfloat16),
                           preferred_element_type=jnp.float32)

        # Embedding lookup as a one-hot matmul (tables are tiny & VMEM-resident).
        def embed(ids_ref, emb_ref):
            ids = ids_ref[...]                              # (N, 1) int32
            n, vocab = ids.shape[0], emb_ref.shape[0]
            iota = jax.lax.broadcasted_iota(jnp.int32, (n, vocab), 1)
            onehot = (iota == ids).astype(jnp.bfloat16)     # (N, vocab) bf16
            return mm(onehot, emb_ref[...])                 # (N, emb) f32

        x_p = embed(pid_ref, pemb_ref)
        x_t = embed(tid_ref, temb_ref)

        adj_pt = adj_pt_ref[...]                            # (N_t, N_p) f32
        adj_tp = adj_tp_ref[...]                            # (N_p, N_t) f32

        # Unrolled GNN layers; x_p / x_t stay in VMEM/registers throughout.
        for l in range(num_layers):
            (wr_pl, wt_pl, b_pl, wr_rv, wt_rv, b_rv) = layer_refs[6 * l:6 * (l + 1)]
            # ('players','plays','team'): dst = team  (sum-aggregated neighbors)
            new_t = (mm(mm(adj_pt, x_p), wr_pl[...])
                     + mm(x_t, wt_pl[...]) + b_pl[...])
            # ('team','rev_plays','players'): dst = players
            new_p = (mm(mm(adj_tp, x_t), wr_rv[...])
                     + mm(x_p, wt_rv[...]) + b_rv[...])
            x_t = jnp.maximum(new_t, 0.0)                   # ReLU in f32 (VPU)
            x_p = jnp.maximum(new_p, 0.0)
            # TODO(synk): F.dropout(p=0.1) is identity in eval mode; skipped.

        team_ref[...] = x_t                                 # second output

        # global_concat_pool + Linear, fused: for each team slot t within a
        # graph, pick that row per graph via an MXU selection matmul and apply
        # the corresponding (H, out_ch) slice of the linear weight.
        n_t = x_t.shape[0]
        out_ch = lin_b_ref.shape[1]
        g_iota = jax.lax.broadcasted_iota(jnp.int32, (num_graphs, n_t), 0)
        n_iota = jax.lax.broadcasted_iota(jnp.int32, (num_graphs, n_t), 1)
        z = jnp.zeros((num_graphs, out_ch), jnp.float32)
        for t in range(teams_per_graph):
            sel = (n_iota == g_iota * teams_per_graph + t).astype(jnp.bfloat16)
            xg = mm(sel, x_t)                               # (G, H) slot-t rows
            z = z + mm(xg, lin_w_ref[t])                    # (G, out_ch)
        z = z + lin_b_ref[...]

        # softmax(dim=-1) in f32; reciprocal on the EUP (approx, nearly free).
        z = z - jnp.max(z, axis=-1, keepdims=True)
        e = jnp.exp(z)
        denom = jnp.sum(e, axis=-1, keepdims=True)
        y_ref[...] = e * pl.reciprocal(denom, approx=True)

    return kernel


def _cost_estimate(n_p, n_t, vocab_p, vocab_t, emb_p, emb_t, hidden, out_ch,
                   num_layers, num_graphs, teams_per_graph, inputs):
    flops = 2 * n_p * vocab_p * emb_p + 2 * n_t * vocab_t * emb_t
    in_p, in_t = emb_p, emb_t
    for _ in range(num_layers):
        flops += 2 * n_t * n_p * in_p + 2 * n_t * in_p * hidden + 2 * n_t * in_t * hidden
        flops += 2 * n_p * n_t * in_t + 2 * n_p * in_t * hidden + 2 * n_p * in_p * hidden
        in_p = in_t = hidden
    flops += teams_per_graph * (2 * num_graphs * n_t * hidden
                                + 2 * num_graphs * hidden * out_ch)
    transcendentals = num_graphs * out_ch + num_graphs       # exp + reciprocal
    bytes_accessed = sum(int(x.size) * x.dtype.itemsize for x in inputs)
    bytes_accessed += num_graphs * out_ch * 4 + n_t * hidden * 4
    return pl.CostEstimate(flops=int(flops),
                           transcendentals=int(transcendentals),
                           bytes_accessed=int(bytes_accessed))


def fused_forward(params, player_node_id, team_node_id, adj_pt, adj_tp,
                  teams_per_graph):
    n_p = player_node_id.shape[0]
    n_t = team_node_id.shape[0]
    hidden = params["layers"][0]["plays"]["w_rel"].shape[1]
    out_ch = params["lin_w"].shape[1]
    num_layers = len(params["layers"])
    num_graphs = n_t // teams_per_graph

    inputs = [player_node_id.reshape(n_p, 1).astype(jnp.int32),
              team_node_id.reshape(n_t, 1).astype(jnp.int32),
              params["player_emb"], params["team_emb"],
              adj_pt, adj_tp]
    for layer in params["layers"]:
        inputs += [layer["plays"]["w_rel"], layer["plays"]["w_root"], layer["plays"]["b"],
                   layer["rev"]["w_rel"], layer["rev"]["w_root"], layer["rev"]["b"]]
    # Pre-split the concat-pool Linear weight into per-team-slot blocks so the
    # kernel never has to reshape across lane boundaries.
    inputs += [params["lin_w"].reshape(teams_per_graph, hidden, out_ch),
               params["lin_b"]]

    vmem = pl.BlockSpec(memory_space=pltpu.MemorySpace.VMEM)
    kernel = _make_fused_kernel(num_layers, num_graphs, teams_per_graph)
    ce = _cost_estimate(n_p, n_t,
                        params["player_emb"].shape[0], params["team_emb"].shape[0],
                        params["player_emb"].shape[1], params["team_emb"].shape[1],
                        hidden, out_ch, num_layers, num_graphs, teams_per_graph,
                        inputs)

    y, team_feats = pl.pallas_call(
        kernel,
        out_shape=(jax.ShapeDtypeStruct((num_graphs, out_ch), jnp.float32),
                   jax.ShapeDtypeStruct((n_t, hidden), jnp.float32)),
        in_specs=[vmem] * len(inputs),
        out_specs=(vmem, vmem),
        cost_estimate=ce,
    )(*inputs)
    return y, team_feats


# ----------------------------------------------------------------------------
# Deterministic parameter construction (shapes follow the PyTorch __init__).
# Lazy (-1) input dims resolved: layer 0 sees embedding dims, layers >=1 hidden.
# ----------------------------------------------------------------------------
def init_params(num_players, num_teams, emb_p, emb_t, hidden, out_ch,
                num_layers, teams_per_graph):
    key = jax.random.PRNGKey(12345)
    ks = iter(jax.random.split(key, 4 + 8 * num_layers))

    def dense(k, fan_in, fan_out):
        lim = 1.0 / jnp.sqrt(jnp.float32(fan_in))
        return jax.random.uniform(k, (fan_in, fan_out), jnp.float32, -lim, lim)

    params = {
        "player_emb": jax.random.normal(next(ks), (num_players, emb_p), jnp.float32),
        "team_emb": jax.random.normal(next(ks), (num_teams, emb_t), jnp.float32),
        "layers": [],
    }
    in_p, in_t = emb_p, emb_t
    for _ in range(num_layers):
        layer = {
            "plays": {  # src=players, dst=team
                "w_rel": dense(next(ks), in_p, hidden),
                "w_root": dense(next(ks), in_t, hidden),
                "b": jax.random.uniform(next(ks), (1, hidden), jnp.float32, -0.1, 0.1),
            },
            "rev": {    # src=team, dst=players
                "w_rel": dense(next(ks), in_t, hidden),
                "w_root": dense(next(ks), in_p, hidden),
                "b": jax.random.uniform(next(ks), (1, hidden), jnp.float32, -0.1, 0.1),
            },
        }
        params["layers"].append(layer)
        in_p = in_t = hidden

    lin_in = teams_per_graph * hidden
    params["lin_w"] = dense(next(ks), lin_in, out_ch)
    params["lin_b"] = jax.random.uniform(next(ks), (1, out_ch), jnp.float32, -0.1, 0.1)
    return params


# Pure-JAX reference (f32) for a loose numerical check of the fused kernel.
def reference_forward(params, player_node_id, team_node_id, adj_pt, adj_tp,
                      teams_per_graph):
    x_p = params["player_emb"][player_node_id]
    x_t = params["team_emb"][team_node_id]
    for layer in params["layers"]:
        new_t = jnp.maximum((adj_pt @ x_p) @ layer["plays"]["w_rel"]
                            + x_t @ layer["plays"]["w_root"] + layer["plays"]["b"], 0.0)
        new_p = jnp.maximum((adj_tp @ x_t) @ layer["rev"]["w_rel"]
                            + x_p @ layer["rev"]["w_root"] + layer["rev"]["b"], 0.0)
        x_t, x_p = new_t, new_p
    g = x_t.shape[0] // teams_per_graph
    pooled = x_t.reshape(g, teams_per_graph * x_t.shape[1])
    z = pooled @ params["lin_w"] + params["lin_b"]
    return jax.nn.softmax(z, axis=-1), x_t


if __name__ == "__main__":
    # Small, self-consistent synthetic problem.
    NUM_PLAYERS_VOCAB = 32
    NUM_TEAMS_VOCAB = 8
    EMB_P = 16
    EMB_T = 16
    HIDDEN = 32
    OUT_CH = 4
    NUM_LAYERS = 2

    N_PLAYER_NODES = 16
    N_TEAM_NODES = 8
    TEAMS_PER_GRAPH = 4          # -> 2 graphs in the batch
    N_EDGES = 32

    key = jax.random.PRNGKey(0)
    k1, k2, k3, k4 = jax.random.split(key, 4)

    player_node_id = jax.random.randint(k1, (N_PLAYER_NODES,), 0, NUM_PLAYERS_VOCAB)
    team_node_id = jax.random.randint(k2, (N_TEAM_NODES,), 0, NUM_TEAMS_VOCAB)

    # ('players','plays','team') edges; rev_plays is the exact reverse.
    src_players = jax.random.randint(k3, (N_EDGES,), 0, N_PLAYER_NODES)
    dst_teams = jax.random.randint(k4, (N_EDGES,), 0, N_TEAM_NODES)
    adj_pt = jnp.zeros((N_TEAM_NODES, N_PLAYER_NODES), jnp.float32)
    adj_pt = adj_pt.at[dst_teams, src_players].add(1.0)   # team <- players
    adj_tp = adj_pt.T                                     # players <- team

    params = init_params(NUM_PLAYERS_VOCAB, NUM_TEAMS_VOCAB, EMB_P, EMB_T,
                         HIDDEN, OUT_CH, NUM_LAYERS, TEAMS_PER_GRAPH)

    y, team_feats = fused_forward(params, player_node_id, team_node_id,
                                  adj_pt, adj_tp, TEAMS_PER_GRAPH)
    jax.block_until_ready((y, team_feats))

    y_ref, team_ref = reference_forward(params, player_node_id, team_node_id,
                                        adj_pt, adj_tp, TEAMS_PER_GRAPH)

    assert y.shape == (N_TEAM_NODES // TEAMS_PER_GRAPH, OUT_CH)
    assert team_feats.shape == (N_TEAM_NODES, HIDDEN)
    assert bool(jnp.all(jnp.isfinite(y))) and bool(jnp.all(jnp.isfinite(team_feats)))
    # approx reciprocal + bf16 matmuls -> generous tolerances
    assert bool(jnp.allclose(jnp.sum(y, axis=-1), 1.0, atol=1e-2))
    assert bool(jnp.allclose(y, y_ref, atol=5e-2, rtol=5e-2))
    assert bool(jnp.allclose(team_feats, team_ref, atol=1e-1, rtol=1e-1))
    print("KERNEL_OK")
</pallas_src>

<mosaic_0001>
module attributes {stable_mosaic.version = 11 : i64} {
  func.func @kernel(%arg0: memref<16x1xi32, #tpu.memory_space<vmem>>, %arg1: memref<8x1xi32, #tpu.memory_space<vmem>>, %arg2: memref<32x16xf32, #tpu.memory_space<vmem>>, %arg3: memref<8x16xf32, #tpu.memory_space<vmem>>, %arg4: memref<8x16xf32, #tpu.memory_space<vmem>>, %arg5: memref<16x8xf32, #tpu.memory_space<vmem>>, %arg6: memref<16x32xf32, #tpu.memory_space<vmem>>, %arg7: memref<16x32xf32, #tpu.memory_space<vmem>>, %arg8: memref<1x32xf32, #tpu.memory_space<vmem>>, %arg9: memref<16x32xf32, #tpu.memory_space<vmem>>, %arg10: memref<16x32xf32, #tpu.memory_space<vmem>>, %arg11: memref<1x32xf32, #tpu.memory_space<vmem>>, %arg12: memref<32x32xf32, #tpu.memory_space<vmem>>, %arg13: memref<32x32xf32, #tpu.memory_space<vmem>>, %arg14: memref<1x32xf32, #tpu.memory_space<vmem>>, %arg15: memref<32x32xf32, #tpu.memory_space<vmem>>, %arg16: memref<32x32xf32, #tpu.memory_space<vmem>>, %arg17: memref<1x32xf32, #tpu.memory_space<vmem>>, %arg18: memref<4x32x4xf32, #tpu.memory_space<vmem>>, %arg19: memref<1x4xf32, #tpu.memory_space<vmem>>, %arg20: memref<2x4xf32, #tpu.memory_space<vmem>>, %arg21: memref<8x32xf32, #tpu.memory_space<vmem>>) attributes {dimension_semantics = [], scalar_prefetch = 0 : i64, scratch_operands = 0 : i64, tpu.core_type = #tpu.core_type<tc>} {
    %c0 = arith.constant 0 : index
    %c0_0 = arith.constant 0 : index
    %0 = vector.load %arg0[%c0, %c0_0] : memref<16x1xi32, #tpu.memory_space<vmem>>, vector<16x1xi32>
    %1 = tpu.iota {dimensions = array<i32: 1>} : vector<16x32xi32>
    %2 = vector.broadcast %0 : vector<16x1xi32> to vector<16x32xi32>
    %3 = arith.cmpi eq, %1, %2 : vector<16x32xi32>
    %4 = arith.extui %3 : vector<16x32xi1> to vector<16x32xi32>
    %5 = arith.sitofp %4 : vector<16x32xi32> to vector<16x32xf32>
    %6 = arith.truncf %5 : vector<16x32xf32> to vector<16x32xbf16>
    %c0_1 = arith.constant 0 : index
    %c0_2 = arith.constant 0 : index
    %7 = vector.load %arg2[%c0_1, %c0_2] : memref<32x16xf32, #tpu.memory_space<vmem>>, vector<32x16xf32>
    %8 = arith.truncf %7 : vector<32x16xf32> to vector<32x16xbf16>
    %cst = arith.constant dense<0.000000e+00> : vector<16x16xf32>
    %9 = tpu.matmul %6, %8, %cst {dimension_numbers = #tpu.dot_dimension_numbers<[1], [0], [0], [1], [0, 0, 1, 1], [], []>} : vector<16x32xbf16>, vector<32x16xbf16>, vector<16x16xf32> -> vector<16x16xf32>
    %c0_3 = arith.constant 0 : index
    %c0_4 = arith.constant 0 : index
    %10 = vector.load %arg1[%c0_3, %c0_4] : memref<8x1xi32, #tpu.memory_space<vmem>>, vector<8x1xi32>
    %11 = tpu.iota {dimensions = array<i32: 1>} : vector<8x8xi32>
    %12 = vector.broadcast %10 : vector<8x1xi32> to vector<8x8xi32>
    %13 = arith.cmpi eq, %11, %12 : vector<8x8xi32>
    %14 = arith.extui %13 : vector<8x8xi1> to vector<8x8xi32>
    %15 = arith.sitofp %14 : vector<8x8xi32> to vector<8x8xf32>
    %16 = arith.truncf %15 : vector<8x8xf32> to vector<8x8xbf16>
    %c0_5 = arith.constant 0 : index
    %c0_6 = arith.constant 0 : index
    %17 = vector.load %arg3[%c0_5, %c0_6] : memref<8x16xf32, #tpu.memory_space<vmem>>, vector<8x16xf32>
    %18 = arith.truncf %17 : vector<8x16xf32> to vector<8x16xbf16>
    %cst_7 = arith.constant dense<0.000000e+00> : vector<8x16xf32>
    %19 = tpu.matmul %16, %18, %cst_7 {dimension_numbers = #tpu.dot_dimension_numbers<[1], [0], [0], [1], [0, 0, 1, 1], [], []>} : vector<8x8xbf16>, vector<8x16xbf16>, vector<8x16xf32> -> vector<8x16xf32>
    %c0_8 = arith.constant 0 : index
    %c0_9 = arith.constant 0 : index
    %20 = vector.load %arg4[%c0_8, %c0_9] : memref<8x16xf32, #tpu.memory_space<vmem>>, vector<8x16xf32>
    %c0_10 = arith.constant 0 : index
    %c0_11 = arith.constant 0 : index
    %21 = vector.load %arg5[%c0_10, %c0_11] : memref<16x8xf32, #tpu.memory_space<vmem>>, vector<16x8xf32>
    %22 = arith.truncf %20 : vector<8x16xf32> to vector<8x16xbf16>
    %23 = arith.truncf %9 : vector<16x16xf32> to vector<16x16xbf16>
    %cst_12 = arith.constant dense<0.000000e+00> : vector<8x16xf32>
    %24 = tpu.matmul %22, %23, %cst_12 {dimension_numbers = #tpu.dot_dimension_numbers<[1], [0], [0], [1], [0, 0, 1, 1], [], []>} : vector<8x16xbf16>, vector<16x16xbf16>, vector<8x16xf32> -> vector<8x16xf32>
    %c0_13 = arith.constant 0 : index
    %c0_14 = arith.constant 0 : index
    %25 = vector.load %arg6[%c0_13, %c0_14] : memref<16x32xf32, #tpu.memory_space<vmem>>, vector<16x32xf32>
    %26 = arith.truncf %24 : vector<8x16xf32> to vector<8x16xbf16>
    %27 = arith.truncf %25 : vector<16x32xf32> to vector<16x32xbf16>
    %cst_15 = arith.constant dense<0.000000e+00> : vector<8x32xf32>
    %28 = tpu.matmul %26, %27, %cst_15 {dimension_numbers = #tpu.dot_dimension_numbers<[1], [0], [0], [1], [0, 0, 1, 1], [], []>} : vector<8x16xbf16>, vector<16x32xbf16>, vector<8x32xf32> -> vector<8x32xf32>
    %c0_16 = arith.constant 0 : index
    %c0_17 = arith.constant 0 : index
    %29 = vector.load %arg7[%c0_16, %c0_17] : memref<16x32xf32, #tpu.memory_space<vmem>>, vector<16x32xf32>
    %30 = arith.truncf %19 : vector<8x16xf32> to vector<8x16xbf16>
    %31 = arith.truncf %29 : vector<16x32xf32> to vector<16x32xbf16>
    %cst_18 = arith.constant dense<0.000000e+00> : vector<8x32xf32>
    %32 = tpu.matmul %30, %31, %cst_18 {dimension_numbers = #tpu.dot_dimension_numbers<[1], [0], [0], [1], [0, 0, 1, 1], [], []>} : vector<8x16xbf16>, vector<16x32xbf16>, vector<8x32xf32> -> vector<8x32xf32>
    %33 = arith.addf %28, %32 : vector<8x32xf32>
    %c0_19 = arith.constant 0 : index
    %c0_20 = arith.constant 0 : index
    %34 = vector.load %arg8[%c0_19, %c0_20] : memref<1x32xf32, #tpu.memory_space<vmem>>, vector<1x32xf32>
    %35 = vector.broadcast %34 : vector<1x32xf32> to vector<8x32xf32>
    %36 = arith.addf %33, %35 : vector<8x32xf32>
    %37 = arith.truncf %21 : vector<16x8xf32> to vector<16x8xbf16>
    %38 = arith.truncf %19 : vector<8x16xf32> to vector<8x16xbf16>
    %cst_21 = arith.constant dense<0.000000e+00> : vector<16x16xf32>
    %39 = tpu.matmul %37, %38, %cst_21 {dimension_numbers = #tpu.dot_dimension_numbers<[1], [0], [0], [1], [0, 0, 1, 1], [], []>} : vector<16x8xbf16>, vector<8x16xbf16>, vector<16x16xf32> -> vector<16x16xf32>
    %c0_22 = arith.constant 0 : index
    %c0_23 = arith.constant 0 : index
    %40 = vector.load %arg9[%c0_22, %c0_23] : memref<16x32xf32, #tpu.memory_space<vmem>>, vector<16x32xf32>
    %41 = arith.truncf %39 : vector<16x16xf32> to vector<16x16xbf16>
    %42 = arith.truncf %40 : vector<16x32xf32> to vector<16x32xbf16>
    %cst_24 = arith.constant dense<0.000000e+00> : vector<16x32xf32>
    %43 = tpu.matmul %41, %42, %cst_24 {dimension_numbers = #tpu.dot_dimension_numbers<[1], [0], [0], [1], [0, 0, 1, 1], [], []>} : vector<16x16xbf16>, vector<16x32xbf16>, vector<16x32xf32> -> vector<16x32xf32>
    %c0_25 = arith.constant 0 : index
    %c0_26 = arith.constant 0 : index
    %44 = vector.load %arg10[%c0_25, %c0_26] : memref<16x32xf32, #tpu.memory_space<vmem>>, vector<16x32xf32>
    %45 = arith.truncf %9 : vector<16x16xf32> to vector<16x16xbf16>
    %46 = arith.truncf %44 : vector<16x32xf32> to vector<16x32xbf16>
    %cst_27 = arith.constant dense<0.000000e+00> : vector<16x32xf32>
    %47 = tpu.matmul %45, %46, %cst_27 {dimension_numbers = #tpu.dot_dimension_numbers<[1], [0], [0], [1], [0, 0, 1, 1], [], []>} : vector<16x16xbf16>, vector<16x32xbf16>, vector<16x32xf32> -> vector<16x32xf32>
    %48 = arith.addf %43, %47 : vector<16x32xf32>
    %c0_28 = arith.constant 0 : index
    %c0_29 = arith.constant 0 : index
    %49 = vector.load %arg11[%c0_28, %c0_29] : memref<1x32xf32, #tpu.memory_space<vmem>>, vector<1x32xf32>
    %50 = vector.broadcast %49 : vector<1x32xf32> to vector<16x32xf32>
    %51 = arith.addf %48, %50 : vector<16x32xf32>
    %cst_30 = arith.constant 0.000000e+00 : f32
    %52 = vector.broadcast %cst_30 : f32 to vector<8x32xf32>
    %53 = arith.maximumf %36, %52 : vector<8x32xf32>
    %cst_31 = arith.constant 0.000000e+00 : f32
    %54 = vector.broadcast %cst_31 : f32 to vector<16x32xf32>
    %55 = arith.maximumf %51, %54 : vector<16x32xf32>
    %56 = arith.truncf %20 : vector<8x16xf32> to vector<8x16xbf16>
    %57 = arith.truncf %55 : vector<16x32xf32> to vector<16x32xbf16>
    %cst_32 = arith.constant dense<0.000000e+00> : vector<8x32xf32>
    %58 = tpu.matmul %56, %57, %cst_32 {dimension_numbers = #tpu.dot_dimension_numbers<[1], [0], [0], [1], [0, 0, 1, 1], [], []>} : vector<8x16xbf16>, vector<16x32xbf16>, vector<8x32xf32> -> vector<8x32xf32>
    %c0_33 = arith.constant 0 : index
    %c0_34 = arith.constant 0 : index
    %59 = vector.load %arg12[%c0_33, %c0_34] : memref<32x32xf32, #tpu.memory_space<vmem>>, vector<32x32xf32>
    %60 = arith.truncf %58 : vector<8x32xf32> to vector<8x32xbf16>
    %61 = arith.truncf %59 : vector<32x32xf32> to vector<32x32xbf16>
    %cst_35 = arith.constant dense<0.000000e+00> : vector<8x32xf32>
    %62 = tpu.matmul %60, %61, %cst_35 {dimension_numbers = #tpu.dot_dimension_numbers<[1], [0], [0], [1], [0, 0, 1, 1], [], []>} : vector<8x32xbf16>, vector<32x32xbf16>, vector<8x32xf32> -> vector<8x32xf32>
    %c0_36 = arith.constant 0 : index
    %c0_37 = arith.constant 0 : index
    %63 = vector.load %arg13[%c0_36, %c0_37] : memref<32x32xf32, #tpu.memory_space<vmem>>, vector<32x32xf32>
    %64 = arith.truncf %53 : vector<8x32xf32> to vector<8x32xbf16>
    %65 = arith.truncf %63 : vector<32x32xf32> to vector<32x32xbf16>
    %cst_38 = arith.constant dense<0.000000e+00> : vector<8x32xf32>
    %66 = tpu.matmul %64, %65, %cst_38 {dimension_numbers = #tpu.dot_dimension_numbers<[1], [0], [0], [1], [0, 0, 1, 1], [], []>} : vector<8x32xbf16>, vector<32x32xbf16>, vector<8x32xf32> -> vector<8x32xf32>
    %67 = arith.addf %62, %66 : vector<8x32xf32>
    %c0_39 = arith.constant 0 : index
    %c0_40 = arith.constant 0 : index
    %68 = vector.load %arg14[%c0_39, %c0_40] : memref<1x32xf32, #tpu.memory_space<vmem>>, vector<1x32xf32>
    %69 = vector.broadcast %68 : vector<1x32xf32> to vector<8x32xf32>
    %70 = arith.addf %67, %69 : vector<8x32xf32>
    %cst_41 = arith.constant 0.000000e+00 : f32
    %71 = vector.broadcast %cst_41 : f32 to vector<8x32xf32>
    %72 = arith.maximumf %70, %71 : vector<8x32xf32>
    %c0_42 = arith.constant 0 : index
    %c0_43 = arith.constant 0 : index
    %73 = vector.load %arg21[%c0_42, %c0_43] : memref<8x32xf32, #tpu.memory_space<vmem>>, vector<8x32xf32>
    tpu.vector_store %arg21[%c0_42, %c0_43], %72 {strides = array<i32>} : memref<8x32xf32, #tpu.memory_space<vmem>>, vector<8x32xf32>,
    %74 = tpu.iota {dimensions = array<i32: 0>} : vector<2x8xi32>
    %75 = tpu.iota {dimensions = array<i32: 1>} : vector<2x8xi32>
    %cst_44 = arith.constant 0.000000e+00 : f32
    %76 = vector.broadcast %cst_44 : f32 to vector<2x4xf32>
    %c4_i32 = arith.constant 4 : i32
    %77 = vector.broadcast %c4_i32 : i32 to vector<2x8xi32>
    %78 = arith.muli %74, %77 : vector<2x8xi32>
    %c0_i32 = arith.constant 0 : i32
    %79 = vector.broadcast %c0_i32 : i32 to vector<2x8xi32>
    %80 = arith.addi %78, %79 : vector<2x8xi32>
    %81 = arith.cmpi eq, %75, %80 : vector<2x8xi32>
    %82 = arith.extui %81 : vector<2x8xi1> to vector<2x8xi32>
    %83 = arith.sitofp %82 : vector<2x8xi32> to vector<2x8xf32>
    %84 = arith.truncf %83 : vector<2x8xf32> to vector<2x8xbf16>
    %85 = arith.truncf %72 : vector<8x32xf32> to vector<8x32xbf16>
    %cst_45 = arith.constant dense<0.000000e+00> : vector<2x32xf32>
    %86 = tpu.matmul %84, %85, %cst_45 {dimension_numbers = #tpu.dot_dimension_numbers<[1], [0], [0], [1], [0, 0, 1, 1], [], []>} : vector<2x8xbf16>, vector<8x32xbf16>, vector<2x32xf32> -> vector<2x32xf32>
    %c0_46 = arith.constant 0 : index
    %c0_47 = arith.constant 0 : index
    %c0_48 = arith.constant 0 : index
    %87 = vector.load %arg18[%c0_46, %c0_47, %c0_48] : memref<4x32x4xf32, #tpu.memory_space<vmem>>, vector<1x32x4xf32>
    %88 = vector.shape_cast %87 : vector<1x32x4xf32> to vector<32x4xf32>
    %89 = arith.truncf %86 : vector<2x32xf32> to vector<2x32xbf16>
    %90 = arith.truncf %88 : vector<32x4xf32> to vector<32x4xbf16>
    %cst_49 = arith.constant dense<0.000000e+00> : vector<2x4xf32>
    %91 = tpu.matmul %89, %90, %cst_49 {dimension_numbers = #tpu.dot_dimension_numbers<[1], [0], [0], [1], [0, 0, 1, 1], [], []>} : vector<2x32xbf16>, vector<32x4xbf16>, vector<2x4xf32> -> vector<2x4xf32>
    %92 = arith.addf %76, %91 : vector<2x4xf32>
    %c4_i32_50 = arith.constant 4 : i32
    %93 = vector.broadcast %c4_i32_50 : i32 to vector<2x8xi32>
    %94 = arith.muli %74, %93 : vector<2x8xi32>
    %c1_i32 = arith.constant 1 : i32
    %95 = vector.broadcast %c1_i32 : i32 to vector<2x8xi32>
    %96 = arith.addi %94, %95 : vector<2x8xi32>
    %97 = arith.cmpi eq, %75, %96 : vector<2x8xi32>
    %98 = arith.extui %97 : vector<2x8xi1> to vector<2x8xi32>
    %99 = arith.sitofp %98 : vector<2x8xi32> to vector<2x8xf32>
    %100 = arith.truncf %99 : vector<2x8xf32> to vector<2x8xbf16>
    %101 = arith.truncf %72 : vector<8x32xf32> to vector<8x32xbf16>
    %cst_51 = arith.constant dense<0.000000e+00> : vector<2x32xf32>
    %102 = tpu.matmul %100, %101, %cst_51 {dimension_numbers = #tpu.dot_dimension_numbers<[1], [0], [0], [1], [0, 0, 1, 1], [], []>} : vector<2x8xbf16>, vector<8x32xbf16>, vector<2x32xf32> -> vector<2x32xf32>
    %c1 = arith.constant 1 : index
    %c0_52 = arith.constant 0 : index
    %c0_53 = arith.constant 0 : index
    %103 = vector.load %arg18[%c1, %c0_52, %c0_53] : memref<4x32x4xf32, #tpu.memory_space<vmem>>, vector<1x32x4xf32>
    %104 = vector.shape_cast %103 : vector<1x32x4xf32> to vector<32x4xf32>
    %105 = arith.truncf %102 : vector<2x32xf32> to vector<2x32xbf16>
    %106 = arith.truncf %104 : vector<32x4xf32> to vector<32x4xbf16>
    %cst_54 = arith.constant dense<0.000000e+00> : vector<2x4xf32>
    %107 = tpu.matmul %105, %106, %cst_54 {dimension_numbers = #tpu.dot_dimension_numbers<[1], [0], [0], [1], [0, 0, 1, 1], [], []>} : vector<2x32xbf16>, vector<32x4xbf16>, vector<2x4xf32> -> vector<2x4xf32>
    %108 = arith.addf %92, %107 : vector<2x4xf32>
    %c4_i32_55 = arith.constant 4 : i32
    %109 = vector.broadcast %c4_i32_55 : i32 to vector<2x8xi32>
    %110 = arith.muli %74, %109 : vector<2x8xi32>
    %c2_i32 = arith.constant 2 : i32
    %111 = vector.broadcast %c2_i32 : i32 to vector<2x8xi32>
    %112 = arith.addi %110, %111 : vector<2x8xi32>
    %113 = arith.cmpi eq, %75, %112 : vector<2x8xi32>
    %114 = arith.extui %113 : vector<2x8xi1> to vector<2x8xi32>
    %115 = arith.sitofp %114 : vector<2x8xi32> to vector<2x8xf32>
    %116 = arith.truncf %115 : vector<2x8xf32> to vector<2x8xbf16>
    %117 = arith.truncf %72 : vector<8x32xf32> to vector<8x32xbf16>
    %cst_56 = arith.constant dense<0.000000e+00> : vector<2x32xf32>
    %118 = tpu.matmul %116, %117, %cst_56 {dimension_numbers = #tpu.dot_dimension_numbers<[1], [0], [0], [1], [0, 0, 1, 1], [], []>} : vector<2x8xbf16>, vector<8x32xbf16>, vector<2x32xf32> -> vector<2x32xf32>
    %c2 = arith.constant 2 : index
    %c0_57 = arith.constant 0 : index
    %c0_58 = arith.constant 0 : index
    %119 = vector.load %arg18[%c2, %c0_57, %c0_58] : memref<4x32x4xf32, #tpu.memory_space<vmem>>, vector<1x32x4xf32>
    %120 = vector.shape_cast %119 : vector<1x32x4xf32> to vector<32x4xf32>
    %121 = arith.truncf %118 : vector<2x32xf32> to vector<2x32xbf16>
    %122 = arith.truncf %120 : vector<32x4xf32> to vector<32x4xbf16>
    %cst_59 = arith.constant dense<0.000000e+00> : vector<2x4xf32>
    %123 = tpu.matmul %121, %122, %cst_59 {dimension_numbers = #tpu.dot_dimension_numbers<[1], [0], [0], [1], [0, 0, 1, 1], [], []>} : vector<2x32xbf16>, vector<32x4xbf16>, vector<2x4xf32> -> vector<2x4xf32>
    %124 = arith.addf %108, %123 : vector<2x4xf32>
    %c4_i32_60 = arith.constant 4 : i32
    %125 = vector.broadcast %c4_i32_60 : i32 to vector<2x8xi32>
    %126 = arith.muli %74, %125 : vector<2x8xi32>
    %c3_i32 = arith.constant 3 : i32
    %127 = vector.broadcast %c3_i32 : i32 to vector<2x8xi32>
    %128 = arith.addi %126, %127 : vector<2x8xi32>
    %129 = arith.cmpi eq, %75, %128 : vector<2x8xi32>
    %130 = arith.extui %129 : vector<2x8xi1> to vector<2x8xi32>
    %131 = arith.sitofp %130 : vector<2x8xi32> to vector<2x8xf32>
    %132 = arith.truncf %131 : vector<2x8xf32> to vector<2x8xbf16>
    %133 = arith.truncf %72 : vector<8x32xf32> to vector<8x32xbf16>
    %cst_61 = arith.constant dense<0.000000e+00> : vector<2x32xf32>
    %134 = tpu.matmul %132, %133, %cst_61 {dimension_numbers = #tpu.dot_dimension_numbers<[1], [0], [0], [1], [0, 0, 1, 1], [], []>} : vector<2x8xbf16>, vector<8x32xbf16>, vector<2x32xf32> -> vector<2x32xf32>
    %c3 = arith.constant 3 : index
    %c0_62 = arith.constant 0 : index
    %c0_63 = arith.constant 0 : index
    %135 = vector.load %arg18[%c3, %c0_62, %c0_63] : memref<4x32x4xf32, #tpu.memory_space<vmem>>, vector<1x32x4xf32>
    %136 = vector.shape_cast %135 : vector<1x32x4xf32> to vector<32x4xf32>
    %137 = arith.truncf %134 : vector<2x32xf32> to vector<2x32xbf16>
    %138 = arith.truncf %136 : vector<32x4xf32> to vector<32x4xbf16>
    %cst_64 = arith.constant dense<0.000000e+00> : vector<2x4xf32>
    %139 = tpu.matmul %137, %138, %cst_64 {dimension_numbers = #tpu.dot_dimension_numbers<[1], [0], [0], [1], [0, 0, 1, 1], [], []>} : vector<2x32xbf16>, vector<32x4xbf16>, vector<2x4xf32> -> vector<2x4xf32>
    %140 = arith.addf %124, %139 : vector<2x4xf32>
    %c0_65 = arith.constant 0 : index
    %c0_66 = arith.constant 0 : index
    %141 = vector.load %arg19[%c0_65, %c0_66] : memref<1x4xf32, #tpu.memory_space<vmem>>, vector<1x4xf32>
    %142 = vector.broadcast %141 : vector<1x4xf32> to vector<2x4xf32>
    %143 = arith.addf %140, %142 : vector<2x4xf32>
    %cst_67 = arith.constant dense<0xFF800000> : vector<2xf32>
    %144 = vector.multi_reduction <maximumf>, %143, %cst_67 [1] : vector<2x4xf32> to vector<2xf32>
    %145 = vector.shape_cast %144 : vector<2xf32> to vector<2x1xf32>
    %146 = vector.broadcast %145 : vector<2x1xf32> to vector<2x4xf32>
    %147 = arith.subf %143, %146 : vector<2x4xf32>
    %148 = math.exp %147 : vector<2x4xf32>
    %cst_68 = arith.constant dense<0.000000e+00> : vector<2xf32>
    %149 = vector.multi_reduction <add>, %148, %cst_68 [1] : vector<2x4xf32> to vector<2xf32>
    %150 = vector.shape_cast %149 : vector<2xf32> to vector<2x1xf32>
    %151 = tpu.reciprocal %150 {approx = true} : vector<2x1xf32> -> vector<2x1xf32>
    %152 = vector.broadcast %151 : vector<2x1xf32> to vector<2x4xf32>
    %153 = arith.mulf %148, %152 : vector<2x4xf32>
    %c0_69 = arith.constant 0 : index
    %c0_70 = arith.constant 0 : index
    %154 = vector.load %arg20[%c0_69, %c0_70] : memref<2x4xf32, #tpu.memory_space<vmem>>, vector<2x4xf32>
    tpu.vector_store %arg20[%c0_69, %c0_70], %153 {strides = array<i32>} : memref<2x4xf32, #tpu.memory_space<vmem>>, vector<2x4xf32>,
    return
  }
}

</mosaic_0001>

<bundles_post_ra>
// kernel: tpu_custom_call.1
= control target key start
LH: loop header
LB: loop body
LE: loop exit
PB: predicated region body
PF: predicated region fallthrough
CT: control target
= control target key end

     0   :  { %s1748_s0 = inlined_call_operand.vmem [shape: s32[16,1], index: 0, kind: input, shape index: {}]   ;;  %s1749_s1 = inlined_call_operand.vmem [shape: s32[8,1], index: 1, kind: input, shape index: {}]   ;;  %s1750_s2 = inlined_call_operand.vmem [shape: f32[32,16], index: 2, kind: input, shape index: {}]   ;;  %s1751_s3 = inlined_call_operand.vmem [shape: f32[8,16], index: 3, kind: input, shape index: {}]   ;;  %s1752_s4 = inlined_call_operand.vmem [shape: f32[8,16], index: 4, kind: input, shape index: {}]   ;;  %s1753_s5 = inlined_call_operand.vmem [shape: f32[16,8], index: 5, kind: input, shape index: {}]   ;;  %s1754_s6 = inlined_call_operand.vmem [shape: f32[16,32], index: 6, kind: input, shape index: {}]   ;;  %s1755_s7 = inlined_call_operand.vmem [shape: f32[16,32], index: 7, kind: input, shape index: {}]   ;;  %s1756_s8 = inlined_call_operand.vmem [shape: f32[1,32], index: 8, kind: input, shape index: {}]   ;;  %s1757_s9 = inlined_call_operand.vmem [shape: f32[16,32], index: 9, kind: input, shape index: {}]   ;;  %s1758_s10 = inlined_call_operand.vmem [shape: f32[16,32], index: 10, kind: input, shape index: {}]   ;;  %s1759_s11 = inlined_call_operand.vmem [shape: f32[1,32], index: 11, kind: input, shape index: {}]   ;;  %s1760_s12 = inlined_call_operand.vmem [shape: f32[32,32], index: 12, kind: input, shape index: {}]   ;;  %s1761_s13 = inlined_call_operand.vmem [shape: f32[32,32], index: 13, kind: input, shape index: {}]   ;;  %s1762_s14 = inlined_call_operand.vmem [shape: f32[1,32], index: 14, kind: input, shape index: {}]   ;;  %s1763_s15 = inlined_call_operand.vmem [shape: f32[32,32], index: 15, kind: input, shape index: {}]   ;;  %s1764_s16 = inlined_call_operand.vmem [shape: f32[32,32], index: 16, kind: input, shape index: {}]   ;;  %s1765_s17 = inlined_call_operand.vmem [shape: f32[1,32], index: 17, kind: input, shape index: {}]   ;;  %s1766_s18 = inlined_call_operand.vmem [shape: f32[4,32,4], index: 18, kind: input, shape index: {}]   ;;  %s1767_s19 = inlined_call_operand.vmem [shape: f32[1,4], index: 19, kind: input, shape index: {}]   ;;  %s1768_s20 = inlined_call_operand.hbm [shape: f32[2,4], index: 20, kind: output, shape index: {0}]   ;;  %s1769_s21 = inlined_call_operand.hbm [shape: f32[8,32], index: 21, kind: output, shape index: {1}]  }
   0x1   :  { %1773 = sst [smem:[#allocation8_spill]] %s1748_s0 }
   0x2   :  { %1774 = sst [smem:[#allocation9_spill]] %s1749_s1 }
   0x3   :  { %1775 = sst [smem:[#allocation10_spill]] %s1750_s2 }
   0x4   :  { %1776 = sst [smem:[#allocation11_spill]] %s1751_s3 }
   0x5   :  { %1777 = sst [smem:[#allocation12_spill]] %s1752_s4 }
   0x6   :  { %1778 = sst [smem:[#allocation13_spill]] %s1753_s5 }
   0x7   :  { %27 = vsyncpa [#allocation3], 0  ;;  %s1779_s25 = sld [smem:[#allocation9_spill]]  ;;  %v1374_v2 = vmov 0   ;;  %vm152_vm0 = vcmask 1043456  }
   0x8   :  { %s1780_s17 = sld [smem:[#allocation8_spill]]  ;;  %1325 = vset.pattern.permute.xlu1 %v1374_v2  ;;  %1324 = vset.pattern.permute.xlu0 %v1374_v2 }
   0x9   :  { %s1781_s28 = sld [smem:[#allocation10_spill]] }
   0xa   :  { %s1782_s5 = sld [smem:[#allocation11_spill]] }
   0xd   :  { %v138_v0 = vld [vmem:[%s1779_s25] sm:$0xff] }
   0xe   :  { %v70_v1 = vld [vmem:[%s1780_s17] sm:$0xff]  ;;  %140 = vperm.xlu1 %1325, %v138_v0  }
   0xf   :  { %v89_v3 = vld [vmem:[%s1781_s28 + $0x10] sm:$0xff]  ;;  %v90_v4 = vld [vmem:[%s1781_s28 + $0x18] sm:$0xff]  ;;  %75 = vperm.xlu0 %1324, %v70_v1   ;;  %v87_v8 = vld [vmem:[%s1781_s28] sm:$0xff] }
  0x10   :  { %v146_v5 = vld [vmem:[%s1782_s5] sm:$0xff]  ;;  %v92_v6 = vpack.c.bf16 %v90_v4, %v89_v3  ;;  %v88_v9 = vld [vmem:[%s1781_s28 + $0x8] sm:$0xff] }
  0x11   :  { %v147_v7 = vpack.c.bf16 %v146_v5, %v146_v5 }
  0x12   :  { %28 = vsyncpa [#allocation5], 0  ;;  %v71_v10 = vld [vmem:[%s1780_s17 + $0x8] sm:$0xff]  ;;  %v1375_v11 = vmov 0.0   ;;  %vm1376_vm1 = vmmov 0   ;;  %v91_v13 = vpack.c.bf16 %v88_v9, %v87_v8  ;;  %v72_v14 = vlaneseq  ;;  %v249_v24 = vld [vmem:[%s1755_s7] sm:$0xff] }
  0x13   :  { %1191 = vmatprep.subr.bf16.mxu0 %v1375_v11  ;;  %1199 = vmatprep.subr.bf16.mxu1 %v1375_v11  ;;  %v154_v12 = vsel %vm152_vm0, %v147_v7, 0  ;;  %vm148_vm3 = vcmask 64512   ;;  %vm93_vm6 = vcmask 261120   ;;  %v250_v25 = vld [vmem:[%s1755_s7 + $0x8] sm:$0xff]  ;;  %vm201_vm7 = vcmask 130048   ;;  %s1783_s3 = sld [smem:[#allocation13_spill]] }
  0x14   :  { %1192 = vmatpush3.bf16.msra.mxu0 %v92_v6  ;;  %1201 = vmatprep.mubr.msk.bf16.mxu1 %vm1376_vm1, %v1375_v11  ;;  %v1524_v15 = vand.u32 127, %v72_v14  ;;  %v252_v26 = vpack.c.bf16 %v250_v25, %v249_v24  ;;  %s1784_s30 = sld [smem:[#allocation12_spill]]  ;;  %v245_v43 = vld [vmem:[%s1754_s6] sm:$0xff]  ;;  %v246_v44 = vld [vmem:[%s1754_s6 + $0x8] sm:$0xff]  ;;  %v551_v2 = vld [vmem:[%s1761_s13 + $0x10] sm:$0xff]  ;;  %vm1063_vm12 = vcmask 25600  }
  0x15   :  { %1200 = vmatpush3.bf16.msra.mxu1 %v154_v12  ;;  %1193 = vmatprep.subr.bf16.mxu0 %v1375_v11  ;;  %v248_v45 = vpack.c.bf16 %v246_v44, %v245_v43  ;;  %v394_v46 = vld [vmem:[%s1757_s9] sm:$0xff]  ;;  %v395_v47 = vld [vmem:[%s1757_s9 + $0x8] sm:$0xff]  ;;  %v552_v3 = vld [vmem:[%s1761_s13 + $0x18] sm:$0xff] }
  0x16   :  { %78 = vperm.xlu0 %1324, %v71_v10   ;;  %1195 = vmatprep.mubr.msk.bf16.mxu0 %vm1376_vm1, %v1375_v11  ;;  %v397_v48 = vpack.c.bf16 %v395_v47, %v394_v46  ;;  %v398_v54 = vld [vmem:[%s1758_s10] sm:$0xff]  ;;  %v399_v55 = vld [vmem:[%s1758_s10 + $0x8] sm:$0xff]  ;;  %v555_v4 = vpack.c.bf16 %v552_v3, %v551_v2  ;;  %s1377_s10 = smov [#allocation4]  }
  0x17   :  { %1205 = vmatprep.subr.bf16.mxu1 %v1375_v11  ;;  %v400_v58 = vpack.c.bf16 %v399_v55, %v398_v54  ;;  %v549_v5 = vld [vmem:[%s1761_s13] sm:$0xff]  ;;  %v550_v6 = vld [vmem:[%s1761_s13 + $0x8] sm:$0xff]  ;;  %s1092_s27 = sshll.u32 %s1377_s10, 4  ;;  %s1093_s27 = int_to_ptr.vmem [resolvable:$true] %s1092_s27 }
  0x18   :  { %1194 = vmatpush3.bf16.msra.mxu0 %v91_v13  ;;  %v554_v7 = vpack.c.bf16 %v550_v6, %v549_v5  ;;  %v1112_v9 = vld [vmem:[%s1756_s8] ss:$0 sm:$0xff]  ;;  %p1335_p1 = scmp.lt.s32.totalorder %s1093_s27, %s1093_s27 }
  0x19   :  { %1211 = vmatprep.subr.bf16.mxu0 %v1375_v11  ;;  %v197_v33 = vld [vmem:[%s1783_s3] sm:$0xff]  ;;  %v198_v34 = vld [vmem:[%s1783_s3 + $0x8] sm:$0xff] }
  0x1a   :  { %v347_v37 = vpack.c.bf16 %v198_v34, %v197_v33  ;;  %v196_v38 = vld [vmem:[%s1784_s30] sm:$0xff] }
  0x1b   :  { %v1559_v42 = vpack.c.bf16 %v196_v38, %v196_v38  ;;  %v1120_v55 = vld [vmem:[%s1762_s14] ss:$0 sm:$0xff] }
  0x1c   :  { %v1125_v6 = vld [vmem:[%s1766_s18 + $0x20] sm:$0xff] }
  0x89   :  { %v141_v16 = vpop.permute.xlu1 %140 }
  0x8a   :  { %v76_v17 = vpop.permute.xlu0 %75  ;;  %vm142_vm2 = vcmp.eq.s32.totalorder %v1524_v15, %v141_v16 }
  0x8b   :  { %v1107_v18 = vsel %vm142_vm2, 1.0, %v1375_v11  ;;  %vm80_vm4 = vcmp.eq.s32.totalorder %v1524_v15, %v76_v17 }
  0x8c   :  { %v145_v19 = vpack.c.bf16 %v1107_v18, %v1107_v18  ;;  %v1104_v21 = vsel %vm80_vm4, 1.0, %v1375_v11 }
  0x8e   :  { %1202 = vmatmul.mubr.msk.bf16.vlgmr.msra.gmra.mxu1 %vm148_vm3, %v145_v19 }
  0x8f   :  { %1207 = vmatprep.mubr.msk.bf16.mxu1 %vm1376_vm1, %v1375_v11 }
  0x91   :  { %v79_v20 = vpop.permute.xlu0 %78 }
  0x92   :  { %vm81_vm5 = vcmp.eq.s32.totalorder %v1524_v15, %v79_v20 }
  0x93   :  { %v1105_v22 = vsel %vm81_vm5, 1.0, %v1375_v11 }
  0x94   :  { %v86_v23 = vpack.c.bf16 %v1105_v22, %v1104_v21 }
  0x96   :  { %1196 = vmatmul.mubr.msk.bf16.vlgmr.msra.gmra.mxu0 %vm93_vm6, %v86_v23 }
  0x97   :  { %1213 = vmatprep.mubr.msk.bf16.mxu0 %vm1376_vm1, %v1375_v11  ;;  %1212 = vmatpush3.bf16.msra.mxu0 %v252_v26  ;;  %v1116_v26 = vld [vmem:[%s1759_s11] ss:$0 sm:$0xff] }
  0x98   :  { %1223 = vmatprep.subr.bf16.mxu0 %v1375_v11 }
 0x14e   :  { %v190_v27 = vpop.f32.mrf.mxu1 }
 0x14f   :  { %v251_v28 = vpack.c.bf16 %v190_v27, %v190_v27 }
 0x150   :  { %v1203_v29 = vpop.f32.mrf.mxu1 }
 0x151   :  { %v351_v30 = vsel %vm152_vm0, %v251_v28, 0  ;;  %1214 = vmatmul.mubr.msk.bf16.vlgmr.msra.gmra.mxu0 %vm201_vm7, %v251_v28 }
 0x152   :  { %v193_v32 = vpop.f32.mrf.mxu1  ;;  %1224 = vmatpush3.bf16.msra.mxu0 %v351_v30  ;;  %1225 = vmatprep.mubr.msk.bf16.mxu0 %vm1376_vm1, %v1375_v11 }
 0x153   :  { %1235 = vmatprep.subr.bf16.mxu0 %v1375_v11 }
 0x154   :  { %v1204_v36 = vpop.f32.mrf.mxu1 }
 0x155   :  { %v544_v36 = vld [vmem:[%s1760_s12 + $0x10] sm:$0xff] }
 0x156   :  { %v131_v31 = vpop.f32.mrf.mxu0 }
 0x158   :  { %v1197_v35 = vpop.f32.mrf.mxu0 }
 0x159   :  { %1226 = vmatmul.mubr.msk.bf16.vlgmr.msra.gmra.mxu0 %vm148_vm3, %v347_v37  ;;  %v545_v37 = vld [vmem:[%s1760_s12 + $0x18] sm:$0xff] }
 0x15a   :  { %v134_v39 = vpop.f32.mrf.mxu0  ;;  %1237 = vmatprep.mubr.msk.bf16.mxu0 %vm1376_vm1, %v1375_v11  ;;  %1236 = vmatpush3.bf16.msra.mxu0 %v397_v48  ;;  %v548_v38 = vpack.c.bf16 %v545_v37, %v544_v36  ;;  %v1133_v36 = vld [vmem:[%s1766_s18 + $0x40] sm:$0xff]  ;;  %v1134_v37 = vld [vmem:[%s1766_s18 + $0x48] sm:$0xff] }
 0x15b   :  { %v200_v40 = vpack.c.bf16 %v134_v39, %v131_v31  ;;  %1247 = vmatprep.subr.bf16.mxu0 %v1375_v11  ;;  %v542_v39 = vld [vmem:[%s1760_s12] sm:$0xff] }
 0x15c   :  { %v1198_v41 = vpop.f32.mrf.mxu0 }
 0x15d   :  { %1206 = vmatpush3.bf16.msra.mxu1 %v200_v40 }
 0x15e   :  { %1217 = vmatprep.subr.bf16.mxu1 %v1375_v11 }
 0x160   :  { %1208 = vmatmul.mubr.msk.bf16.vlgmr.msra.gmra.mxu1 %vm201_vm7, %v1559_v42 }
 0x161   :  { %1219 = vmatprep.mubr.msk.bf16.mxu1 %vm1376_vm1, %v1375_v11  ;;  %1218 = vmatpush3.bf16.msra.mxu1 %v248_v45 }
 0x162   :  { %1229 = vmatprep.subr.bf16.mxu1 %v1375_v11 }
 0x211   :  { %v290_v49 = vpop.f32.mrf.mxu0 }
 0x213   :  { %v1215_v50 = vpop.f32.mrf.mxu0 }
 0x215   :  { %v293_v51 = vpop.f32.mrf.mxu0 }
 0x216   :  { %v653_v51 = vshrl.u32 %v72_v14, 7 }
 0x217   :  { %v1216_v52 = vpop.f32.mrf.mxu0 }
 0x218   :  { %v654_v52 = vmul.u32 4, %v653_v51 }
 0x219   :  { %v387_v53 = vpop.f32.mrf.mxu0 }
 0x21a   :  { %vm655_vm9 = vcmp.eq.s32.totalorder %v1524_v15, %v654_v52 }
 0x21b   :  { %v1227_v56 = vpop.f32.mrf.mxu0  ;;  %v1121_v14 = vsel %vm655_vm9, 1.0, %v1375_v11 }
 0x21d   :  { %v390_v60 = vpop.f32.mrf.mxu0 }
 0x21e   :  { %v396_v61 = vpack.c.bf16 %v390_v60, %v387_v53  ;;  %v713_v53 = vadd.s32 1, %v654_v52 }
 0x21f   :  { %v1228_v63 = vpop.f32.mrf.mxu0 }
 0x220   :  { %v239_v57 = vpop.f32.mrf.mxu1  ;;  %1238 = vmatmul.mubr.msk.bf16.vlgmr.msra.gmra.mxu0 %vm201_vm7, %v396_v61  ;;  %vm714_vm8 = vcmp.eq.s32.totalorder %v1524_v15, %v713_v53  ;;  %v1140_v53 = vld [vmem:[%s1766_s18 + $0x60] sm:$0xff] }
 0x221   :  { %v247_v59 = vpack.c.bf16 %v239_v57, %v239_v57  ;;  %1251 = vmatprep.mubr.msk.bf16.mxu0 %vm1376_vm1, %v1375_v11  ;;  %1248 = vmatpush3.bf16.msra.mxu0 %v555_v4  ;;  %v658_v4 = vpack.c.bf16 %v1121_v14, %v1121_v14 }
 0x222   :  { %v1209_v62 = vpop.f32.mrf.mxu1  ;;  %1249 = vmatprep.subr.bf16.mxu0 %v1375_v11 }
 0x223   :  { %1220 = vmatmul.mubr.msk.bf16.vlgmr.msra.gmra.mxu1 %vm201_vm7, %v247_v59  ;;  %v1123_v62 = vsel %vm714_vm8, 1.0, %v1375_v11 }
 0x224   :  { %v242_v0 = vpop.f32.mrf.mxu1  ;;  %1230 = vmatpush3.bf16.msra.mxu1 %v400_v58  ;;  %1231 = vmatprep.mubr.msk.bf16.mxu1 %vm1376_vm1, %v1375_v11  ;;  %v717_v3 = vpack.c.bf16 %v1123_v62, %v1123_v62 }
 0x225   :  { %1241 = vmatprep.subr.bf16.mxu1 %v1375_v11  ;;  %1250 = vmatpush3.bf16.msra.mxu0 %v554_v7  ;;  %v1127_v0 = vld [vmem:[%s1766_s18 + $0x30] sm:$0xff]  ;;  %v1126_v7 = vld [vmem:[%s1766_s18 + $0x28] sm:$0xff] }
 0x226   :  { %v1210_v1 = vpop.f32.mrf.mxu1  ;;  %1263 = vmatprep.subr.bf16.mxu0 %v1375_v11 }
 0x227   :  { %v1128_v1 = vld [vmem:[%s1766_s18 + $0x38] sm:$0xff] }
 0x228   :  { %v768_v5 = vpack.c.bf16 %v1128_v1, %v1127_v0 }
 0x22b   :  { %1232 = vmatmul.mubr.msk.bf16.vlgmr.msra.gmra.mxu1 %vm201_vm7, %v200_v40  ;;  %v543_v40 = vld [vmem:[%s1760_s12 + $0x8] sm:$0xff] }
 0x22c   :  { %1243 = vmatprep.mubr.msk.bf16.mxu1 %vm1376_vm1, %v1375_v11  ;;  %v547_v41 = vpack.c.bf16 %v543_v40, %v542_v39 }
 0x2e0   :  { %v482_v12 = vpop.f32.mrf.mxu0 }
 0x2e2   :  { %v1239_v17 = vpop.f32.mrf.mxu0 }
 0x2e3   :  { %v333_v8 = vpop.f32.mrf.mxu1 }
 0x2e4   :  { %v334_v10 = vadd.f32 %v333_v8, %v290_v49  ;;  %v485_v20 = vpop.f32.mrf.mxu0  ;;  %v767_v8 = vpack.c.bf16 %v1126_v7, %v1125_v6 }
 0x2e5   :  { %v1221_v13 = vpop.f32.mrf.mxu1 }
 0x2e6   :  { %v346_v16 = vadd.f32 %v1112_v9, %v334_v10  ;;  %v1240_v23 = vpop.f32.mrf.mxu0  ;;  %v708_v9 = vld [vmem:[%s1766_s18 + $0x10] sm:$0xff]  ;;  %v709_v10 = vld [vmem:[%s1766_s18 + $0x18] sm:$0xff]  ;;  %v706_v13 = vld [vmem:[%s1766_s18] sm:$0xff] }
 0x2e7   :  { %v336_v18 = vpop.f32.mrf.mxu1 }
 0x2e8   :  { %v498_v19 = vmax.f32 %v346_v16, 0.0  ;;  %v707_v16 = vld [vmem:[%s1766_s18 + $0x8] sm:$0xff]  ;;  %v855_v18 = vadd.s32 2, %v654_v52 }
 0x2e9   :  { %v1222_v21 = vpop.f32.mrf.mxu1  ;;  %v711_v17 = vpack.c.bf16 %v707_v16, %v706_v13 }
 0x2ea   :  { %v553_v22 = vpack.c.bf16 %v498_v19, %v498_v19  ;;  %vm856_vm10 = vcmp.eq.s32.totalorder %v1524_v15, %v855_v18 }
 0x2eb   :  { %v438_v24 = vpop.f32.mrf.mxu1 }
 0x2ec   :  { %v483_v25 = vadd.f32 %v482_v12, %v438_v24  ;;  %1252 = vmatmul.mubr.msk.bf16.vlgmr.msra.gmra.mxu0 %vm93_vm6, %v553_v22  ;;  %v712_v12 = vpack.c.bf16 %v709_v10, %v708_v9 }
 0x2ed   :  { %v1233_v27 = vpop.f32.mrf.mxu1  ;;  %1265 = vmatprep.mubr.msk.bf16.mxu0 %vm1376_vm1, %v1375_v11 }
 0x2ee   :  { %v496_v29 = vadd.f32 %v1116_v26, %v483_v25 }
 0x2ef   :  { %v441_v28 = vpop.f32.mrf.mxu1 }
 0x2f0   :  { %v486_v30 = vadd.f32 %v485_v20, %v441_v28  ;;  %v499_v33 = vmax.f32 %v496_v29, 0.0  ;;  %v955_v28 = vadd.s32 3, %v654_v52 }
 0x2f1   :  { %v1234_v31 = vpop.f32.mrf.mxu1 }
 0x2f2   :  { %v497_v32 = vadd.f32 %v1116_v26, %v486_v30  ;;  %v1131_v26 = vsel %vm856_vm10, 1.0, %v1375_v11  ;;  %vm956_vm11 = vcmp.eq.s32.totalorder %v1524_v15, %v955_v28 }
 0x2f3   :  { %v859_v31 = vpack.c.bf16 %v1131_v26, %v1131_v26 }
 0x2f4   :  { %v500_v34 = vmax.f32 %v497_v32, 0.0  ;;  %v1138_v32 = vsel %vm956_vm11, 1.0, %v1375_v11 }
 0x2f6   :  { %v501_v35 = vpack.c.bf16 %v500_v34, %v499_v33  ;;  %v959_v33 = vpack.c.bf16 %v1138_v32, %v1138_v32  ;;  %v1135_v34 = vld [vmem:[%s1766_s18 + $0x50] sm:$0xff] }
 0x2f8   :  { %1242 = vmatpush3.bf16.msra.mxu1 %v501_v35  ;;  %v1136_v35 = vld [vmem:[%s1766_s18 + $0x58] sm:$0xff] }
 0x2f9   :  { %1255 = vmatprep.subr.bf16.mxu1 %v1375_v11  ;;  %v910_v15 = vpack.c.bf16 %v1136_v35, %v1135_v34 }
 0x2fb   :  { %1244 = vmatmul.mubr.msk.bf16.vlgmr.msra.gmra.mxu1 %vm201_vm7, %v1559_v42 }
 0x2fc   :  { %1259 = vmatprep.mubr.msk.bf16.mxu1 %vm1376_vm1, %v1375_v11  ;;  %1256 = vmatpush3.bf16.msra.mxu1 %v548_v38  ;;  %v909_v38 = vpack.c.bf16 %v1134_v37, %v1133_v36 }
 0x2fd   :  { %1257 = vmatprep.subr.bf16.mxu1 %v1375_v11 }
 0x300   :  { %1258 = vmatpush3.bf16.msra.mxu1 %v547_v41 }
 0x301   :  { %1269 = vmatprep.subr.bf16.mxu1 %v1375_v11 }
 0x3ac   :  { %v593_v42 = vpop.f32.mrf.mxu0 }
 0x3ae   :  { %v1253_v43 = vpop.f32.mrf.mxu0 }
 0x3b0   :  { %v596_v44 = vpop.f32.mrf.mxu0 }
 0x3b2   :  { %v1254_v45 = vpop.f32.mrf.mxu0 }
 0x3bb   :  { %v536_v46 = vpop.f32.mrf.mxu1 }
 0x3bc   :  { %v546_v47 = vpack.c.bf16 %v536_v46, %v536_v46  ;;  %v1142_v46 = vld [vmem:[%s1766_s18 + $0x70] sm:$0xff] }
 0x3bd   :  { %v1245_v48 = vpop.f32.mrf.mxu1 }
 0x3be   :  { %1260 = vmatmul.mubr.msk.bf16.vlgmr.msra.gmra.mxu1 %vm93_vm6, %v546_v47  ;;  %v1143_v47 = vld [vmem:[%s1766_s18 + $0x78] sm:$0xff] }
 0x3bf   :  { %v539_v49 = vpop.f32.mrf.mxu1  ;;  %1271 = vmatprep.mubr.msk.bf16.mxu1 %vm1376_vm1, %v1375_v11  ;;  %v1010_v51 = vpack.c.bf16 %v1143_v47, %v1142_v46 }
 0x3c1   :  { %v1246_v50 = vpop.f32.mrf.mxu1 }
 0x47e   :  { %v636_v54 = vpop.f32.mrf.mxu1 }
 0x47f   :  { %v637_v56 = vadd.f32 %v636_v54, %v593_v42  ;;  %v1141_v54 = vld [vmem:[%s1766_s18 + $0x68] sm:$0xff] }
 0x480   :  { %v1261_v57 = vpop.f32.mrf.mxu1 }
 0x481   :  { %v649_v58 = vadd.f32 %v1120_v55, %v637_v56  ;;  %v1009_v57 = vpack.c.bf16 %v1141_v54, %v1140_v53 }
 0x482   :  { %v639_v59 = vpop.f32.mrf.mxu1 }
 0x483   :  { %v650_v60 = vmax.f32 %v649_v58, 0.0 }
 0x484   :  { %v1262_v61 = vpop.f32.mrf.mxu1 }
 0x485   :  { %v659_v63 = vpack.c.bf16 %v650_v60, %v650_v60  ;;  %651 = vst.msk [vmem:[#allocation4] sm:$0xff] %vm93_vm6, %v650_v60 }
 0x487   :  { %v664_v2 = vsel %vm152_vm0, %v659_v63, 0 }
 0x488   :  { %1264 = vmatpush3.bf16.msra.mxu0 %v664_v2  ;;  %1270 = vmatpush3.bf16.msra.mxu1 %v664_v2 }
 0x489   :  { %1275 = vmatprep.subr.bf16.mxu0 %v1375_v11  ;;  %1283 = vmatprep.subr.bf16.mxu1 %v1375_v11 }
 0x48b   :  { %1272 = vmatmul.mubr.msk.bf16.vlgmr.msra.gmra.mxu1 %vm148_vm3, %v717_v3  ;;  %1266 = vmatmul.mubr.msk.bf16.vlgmr.msra.gmra.mxu0 %vm148_vm3, %v658_v4 }
 0x48c   :  { %1276 = vmatpush3.bf16.msra.mxu0 %v768_v5  ;;  %1279 = vmatprep.mubr.msk.bf16.mxu0 %vm1376_vm1, %v1375_v11  ;;  %v1145_v5 = vld [vmem:[%s1767_s19] ss:$0 sm:$0xff]  ;;  %s1330_s19 = scalar_lea.vmem %s1093_s27, 128 }
 0x48d   :  { %1277 = vmatprep.subr.bf16.mxu0 %v1375_v11  ;;  %1287 = vmatprep.mubr.msk.bf16.mxu1 %vm1376_vm1, %v1375_v11  ;;  %p1331_p0 = scmp.ne.s32.totalorder %s1093_s27, %s1330_s19  ;;  %p1336_p2 = scmp.lt.s32.totalorder %s1330_s19, %s1330_s19 }
 0x48e   :  { %1284 = vmatpush3.bf16.msra.mxu1 %v712_v12 }
 0x48f   :  { %1285 = vmatprep.subr.bf16.mxu1 %v1375_v11  ;;  %p1337_p3 = por %p1336_p2, %p1335_p1 }
 0x490   :  { %1278 = vmatpush3.bf16.msra.mxu0 %v767_v8 }
 0x491   :  { %1291 = vmatprep.subr.bf16.mxu0 %v1375_v11  ;;  %p1338_p4 = pnand %p1337_p3, %p1331_p0 }
 0x492   :  { %1286 = vmatpush3.bf16.msra.mxu1 %v711_v17 }
 0x493   :  { %1297 = vmatprep.subr.bf16.mxu1 %v1375_v11 }
 0x54b   :  { %v755_v19 = vpop.f32.mrf.mxu1  ;;  %v700_v20 = vpop.f32.mrf.mxu0 }
 0x54c   :  { %v766_v21 = vpack.c.bf16 %v755_v19, %v755_v19  ;;  %v710_v22 = vpack.c.bf16 %v700_v20, %v700_v20 }
 0x54d   :  { %v1273_v23 = vpop.f32.mrf.mxu1  ;;  %v1267_v24 = vpop.f32.mrf.mxu0 }
 0x54e   :  { %1280 = vmatmul.mubr.msk.bf16.vlgmr.msra.gmra.mxu0 %vm93_vm6, %v766_v21  ;;  %1288 = vmatmul.mubr.msk.bf16.vlgmr.msra.gmra.mxu1 %vm93_vm6, %v710_v22 }
 0x54f   :  { %1292 = vmatpush3.bf16.msra.mxu0 %v664_v2  ;;  %v758_v25 = vpop.f32.mrf.mxu1  ;;  %1293 = vmatprep.mubr.msk.bf16.mxu0 %vm1376_vm1, %v1375_v11  ;;  %v703_v27 = vpop.f32.mrf.mxu0 }
 0x550   :  { %1305 = vmatprep.subr.bf16.mxu0 %v1375_v11  ;;  %1301 = vmatprep.mubr.msk.bf16.mxu1 %vm1376_vm1, %v1375_v11 }
 0x551   :  { %v1274_v29 = vpop.f32.mrf.mxu1  ;;  %v1268_v30 = vpop.f32.mrf.mxu0  ;;  %1298 = vmatpush3.bf16.msra.mxu1 %v910_v15 }
 0x552   :  { %1299 = vmatprep.subr.bf16.mxu1 %v1375_v11 }
 0x555   :  { %1300 = vmatpush3.bf16.msra.mxu1 %v909_v38 }
 0x556   :  { %1294 = vmatmul.mubr.msk.bf16.vlgmr.msra.gmra.mxu0 %vm148_vm3, %v859_v31  ;;  %1311 = vmatprep.subr.bf16.mxu1 %v1375_v11 }
 0x557   :  { %1306 = vmatpush3.bf16.msra.mxu0 %v664_v2  ;;  %1307 = vmatprep.mubr.msk.bf16.mxu0 %vm1376_vm1, %v1375_v11 }
 0x55e   :  { %1308 = vmatmul.mubr.msk.bf16.vlgmr.msra.gmra.mxu0 %vm148_vm3, %v959_v33 }
 0x60e   :  { %v806_v39 = vpop.f32.mrf.mxu0  ;;  %v849_v40 = vpop.f32.mrf.mxu1 }
 0x60f   :  { %v850_v41 = vadd.f32 %v849_v40, %v806_v39 }
 0x610   :  { %v1281_v42 = vpop.f32.mrf.mxu0  ;;  %v1289_v43 = vpop.f32.mrf.mxu1 }
 0x612   :  { %v809_v44 = vpop.f32.mrf.mxu0  ;;  %v852_v45 = vpop.f32.mrf.mxu1 }
 0x614   :  { %v1282_v48 = vpop.f32.mrf.mxu0  ;;  %v1290_v49 = vpop.f32.mrf.mxu1 }
 0x616   :  { %v897_v50 = vpop.f32.mrf.mxu0 }
 0x617   :  { %v908_v52 = vpack.c.bf16 %v897_v50, %v897_v50 }
 0x618   :  { %v1295_v55 = vpop.f32.mrf.mxu0 }
 0x619   :  { %1302 = vmatmul.mubr.msk.bf16.vlgmr.msra.gmra.mxu1 %vm93_vm6, %v908_v52 }
 0x61a   :  { %v900_v56 = vpop.f32.mrf.mxu0  ;;  %1312 = vmatpush3.bf16.msra.mxu1 %v1010_v51  ;;  %1315 = vmatprep.mubr.msk.bf16.mxu1 %vm1376_vm1, %v1375_v11 }
 0x61b   :  { %1313 = vmatprep.subr.bf16.mxu1 %v1375_v11 }
 0x61c   :  { %v1296_v58 = vpop.f32.mrf.mxu0 }
 0x61e   :  { %v997_v59 = vpop.f32.mrf.mxu0  ;;  %1314 = vmatpush3.bf16.msra.mxu1 %v1009_v57 }
 0x61f   :  { %v1008_v60 = vpack.c.bf16 %v997_v59, %v997_v59 }
 0x620   :  { %v1309_v61 = vpop.f32.mrf.mxu0 }
 0x621   :  { %1316 = vmatmul.mubr.msk.bf16.vlgmr.msra.gmra.mxu1 %vm93_vm6, %v1008_v60 }
 0x622   :  { %v1000_v62 = vpop.f32.mrf.mxu0 }
 0x624   :  { %v1310_v14 = vpop.f32.mrf.mxu0 }
 0x6d9   :  { %v948_v63 = vpop.f32.mrf.mxu1 }
 0x6da   :  { %v954_v3 = vadd.f32 %v948_v63, %v850_v41 }
 0x6db   :  { %v1303_v0 = vpop.f32.mrf.mxu1 }
 0x6dd   :  { %v951_v1 = vpop.f32.mrf.mxu1 }
 0x6df   :  { %v1304_v2 = vpop.f32.mrf.mxu1 }
 0x6e1   :  { %v1048_v4 = vpop.f32.mrf.mxu1 }
 0x6e2   :  { %v1054_v11 = vadd.f32 %v1048_v4, %v954_v3 }
 0x6e3   :  { %v1317_v6 = vpop.f32.mrf.mxu1 }
 0x6e4   :  { %v1062_v7 = vadd.f32 %v1145_v5, %v1054_v11 }
 0x6e5   :  { %v1051_v8 = vpop.f32.mrf.mxu1 }
 0x6e6   :  { %v1064_v9 = vsel %vm1063_vm12, %v1062_v7, -inf }
 0x6e7   :  { %1065 = vmax.xlane.f32.xlu1 %v1064_v9  ;;  %v1318_v10 = vpop.f32.mrf.mxu1 }
 0x770   :  { %v1066_v12 = vpop.xlane.xlu1 %1065 }
 0x771   :  { %v1067_v13 = vsub.f32 %v1062_v7, %v1066_v12 }
 0x773   :  { %v1068_v16 = vmul.f32 1.442695, %v1067_v13 }
 0x775   :  { %1326 = vpow2.f32 %v1068_v16 }
 0x782   :  { %v1327_v17 = vpop.eup %1326 }
 0x783   :  { %v1070_v18 = vsel %vm1063_vm12, %v1327_v17, 0.0 }
 0x784   :  { %1071 = vadd.xlane.f32.xlu0 %v1070_v18 }
 0x785   :  { %1341 = shalt.err (!%p1338_p4)
}
 0x786   :  { %1095 = dma.vmem_to_hbm [thread:$0]  %s1093_s27, 128, %s1769_s21, [#allocation5]  }
 0x787   :  { %s1378_s28 = smov [#allocation2]  }
 0x788   :  { %s1082_s29 = sshll.u32 %s1378_s28, 4  ;;  %s1083_s29 = int_to_ptr.vmem [resolvable:$true] %s1082_s29 }
 0x789   :  { %s1350_s0 = scalar_lea.vmem %s1083_s29, 32  ;;  %p1355_p6 = scmp.lt.s32.totalorder %s1083_s29, %s1083_s29 }
 0x78a   :  { %p1351_p5 = scmp.ne.s32.totalorder %s1083_s29, %s1350_s0  ;;  %p1356_p7 = scmp.lt.s32.totalorder %s1350_s0, %s1350_s0 }
 0x78c   :  { %p1357_p8 = por %p1356_p7, %p1355_p6 }
 0x78e   :  { %p1358_p9 = pnand %p1357_p8, %p1351_p5 }
 0x80d   :  { %v1072_v19 = vpop.xlane.xlu0 %1071 }
 0x80e   :  { %1328 = vrcp.f32 %v1072_v19 }
 0x81b   :  { %v1329_v20 = vpop.eup %1328 }
 0x81c   :  { %v1074_v21 = vmul.f32 %v1329_v20, %v1327_v17 }
 0x81e   :  { %1075 = vst.msk [vmem:[#allocation2] sm:$0x3] %vm1063_vm12, %v1074_v21 }
 0x81f   :  { %1361 = shalt.err (!%p1358_p9)
}
 0x820   :  { %1085 = dma.vmem_to_hbm [thread:$0]  %s1083_s29, 32, %s1768_s20, [#allocation3]  }
 0x821   :  { %1370 = dma.done.wait [#allocation3], 32  }
 0x822   :  { %1371 = vsyncadd [#allocation3], 4294967264 }
 0x823   :  { %1372 = dma.done.wait [#allocation5], 128  }
 0x824   :  { %1373 = vsyncadd [#allocation5], 4294967168 }
 0x825   :  { %1102 = vsyncpa [#allocation3], 1 }
 0x826   :  { %1103 = vsyncpa [#allocation5], 1 }

</bundles_post_ra>
